<compile_context>
chip_gen: v5e
topology: v5e:2x2
jax: 0.10.0
libtpu: 0.0.40
codegen_flags: <defaults>
</compile_context>

<pallas_src>
import math

import jax
import jax.numpy as jnp
from jax.experimental import pallas as pl
from jax.experimental.pallas import tpu as pltpu

_NEG_INV_LOG2 = -1.0 / math.log(2.0)


def _kernel(px_ref, avg_ref, w1_ref, b1_ref, w2_ref, b2_ref, out_ref):
    # px_ref : (C, tH*W)   flattened (h, w) -> h*W + w ; lane axis = tH*W (dense)
    # avg_ref: (tH*W, tH)  block-diagonal matrix of 1/W (mean over W via one MXU matmul)
    # w1/w2  : (C, C) PyTorch (out, in) layout; b1/b2: (C, 1); out_ref: (C, tH)
    # TODO(synk): if profiling on v7x shows the single EUP slot (jnp.log) binds at the
    # 3.2 TB/s HBM feed rate, replace with a VALU log2 (pltpu.bitcast exponent
    # extraction + short mantissa polynomial) fused with the max().
    hx = jnp.maximum(jnp.log(px_ref[...]) * _NEG_INV_LOG2, 0.0)       # (C, tH*W)
    hx_mean = jnp.dot(hx, avg_ref[...],
                      preferred_element_type=jnp.float32)             # (C, tH) mean over W
    h1 = jnp.dot(w1_ref[...], hx_mean,
                 preferred_element_type=jnp.float32) + b1_ref[...]    # fc1
    h1 = jnp.maximum(h1, 0.0)                                         # ReLU
    y = jnp.dot(w2_ref[...], h1,
                preferred_element_type=jnp.float32) + b2_ref[...]     # fc2
    out_ref[...] = jax.nn.sigmoid(y).astype(out_ref.dtype)            # (C, tH)


def _tpu_caps():
    """(vmem_capacity_bytes, tensorcores_per_chip, is_v5e) -- best effort, never raises."""
    kind = ""
    try:
        kind = jax.devices()[0].device_kind.lower()
    except Exception:
        pass
    if "v7" in kind:
        vmem_cap = 64 << 20
    elif kind:
        vmem_cap = 128 << 20
    else:
        vmem_cap = 64 << 20          # unknown: be conservative
    try:
        vmem_cap = int(pltpu.get_tpu_info().vmem_capacity_bytes)
    except Exception:
        pass
    tc_per_chip = 2 if "v7" in kind else 1
    is_v5e = ("v5 lite" in kind) or ("v5e" in kind) or ("v5lite" in kind)
    return vmem_cap, tc_per_chip, is_v5e


def _pick_h_tile(B, C, H, W, itemsize=4):
    """Pick tH for the flattened (C, tH*W) px layout / (C, tH) output.

    Legality (Mosaic (8,128) rule): tH == H, or (tH % 128 == 0 and H % tH == 0).
    Constraints (perf review):
      * px slab   C*tH*W*4   <= generation-aware budget (8 MiB on 64 MiB-VMEM
        parts, 14 MiB on 128 MiB parts) -- bigger tiles amortise per-step cost.
      * avg matrix tH^2*W*4  <= ~2 MiB (quadratic in tH; also bounds the MXU
        push count of the block-diagonal reduction whose useful-MAC fraction is 1/tH).
      * prefer tH <= 256 (<= 128 on v5e when C is small).
      * keep >= 4 grid steps on v7x (2 TCs) / >= 2 elsewhere when a smaller
        legal tile exists, so megacore + software pipelining have work.
    """
    vmem_cap, tc_per_chip, is_v5e = _tpu_caps()
    small_vmem = vmem_cap <= (64 << 20)
    px_budget = (8 << 20) if small_vmem else (14 << 20)
    avg_budget = 2 << 20

    cands = [t for t in range(128, H, 128) if H % t == 0]
    cands.append(H)

    def px_bytes(t):
        return C * t * W * itemsize

    def avg_bytes(t):
        return t * W * t * itemsize

    fitting = [t for t in cands
               if px_bytes(t) <= px_budget and avg_bytes(t) <= avg_budget]
    if not fitting:
        # No legal tile fits the budgets (e.g. H with no 128-multiple divisor):
        # best effort with the smallest-footprint legal tile.
        # TODO(synk): pad H to a multiple of 128 in the wrapper for such shapes.
        return min(cands, key=lambda t: avg_bytes(t) + px_bytes(t))

    mxu_cap = 128 if (is_v5e and C <= 32) else 256
    pool = [t for t in fitting if t <= mxu_cap] or fitting
    tH = max(pool)

    min_steps = 4 if tc_per_chip >= 2 else 2
    if B * (H // tH) < min_steps:
        smaller = [t for t in pool if B * (H // t) >= min_steps]
        if smaller:
            tH = max(smaller)
    return tH


def _build_call(B, C, H, W, tH, single_buffer_invariants, vmem_limit_bytes):
    n_h = H // tH

    if single_buffer_invariants:
        def inv_spec(shape):
            # Block index never changes -> DMA'd once; single buffer returns the
            # second pipeline buffer's VMEM to the px-tile budget.
            return pl.BlockSpec(shape, lambda b, h: (0, 0),
                                pipeline_mode=pl.Buffered(1))
    else:
        def inv_spec(shape):
            return pl.BlockSpec(shape, lambda b, h: (0, 0))

    grid_spec = pltpu.PrefetchScalarGridSpec(
        num_scalar_prefetch=0,
        grid=(B, n_h),
        in_specs=[
            pl.BlockSpec((None, C, tH * W), lambda b, h: (b, 0, h)),   # px tile
            inv_spec((tH * W, tH)),                                    # avg (1/W folded in)
            inv_spec((C, C)),                                          # w1
            inv_spec((C, 1)),                                          # b1
            inv_spec((C, C)),                                          # w2
            inv_spec((C, 1)),                                          # b2
        ],
        out_specs=pl.BlockSpec((None, C, tH), lambda b, h: (b, 0, h)),
    )

    params = dict(dimension_semantics=("parallel", "parallel"))
    if vmem_limit_bytes is not None:
        params["vmem_limit_bytes"] = int(vmem_limit_bytes)

    return pl.pallas_call(
        _kernel,
        out_shape=jax.ShapeDtypeStruct((B, C, H), jnp.float32),
        grid_spec=grid_spec,
        compiler_params=pltpu.CompilerParams(**params),
    )


def latitude_adaptive(px, w1, b1, w2, b2):
    """px: (B, C, H, W) float32. w1/w2: (C, C) PyTorch-style (out, in). b1/b2: (C,).

    Returns yita: (B, C, H) float32.
    """
    B, C, H, W = px.shape
    px_flat = jnp.asarray(px, jnp.float32).reshape(B, C, H * W)   # free view; lane axis = H*W
    w1 = jnp.asarray(w1, jnp.float32)
    w2 = jnp.asarray(w2, jnp.float32)
    b1_col = jnp.asarray(b1, jnp.float32).reshape(C, 1)
    b2_col = jnp.asarray(b2, jnp.float32).reshape(C, 1)

    vmem_cap, _, _ = _tpu_caps()
    tH = _pick_h_tile(B, C, H, W)

    # Block-diagonal averaging matrix with 1/W folded in: column h_local sums
    # (and scales) the W lanes belonging to local row h_local of the flattened tile.
    grp = jnp.arange(tH * W, dtype=jnp.int32) // W
    cols = jnp.arange(tH, dtype=jnp.int32)
    avg = jnp.where(grp[:, None] == cols[None, :],
                    jnp.float32(1.0 / W), jnp.float32(0.0))

    def vmem_need(inv_bufs):
        # px/out tiles double-buffered; invariant operands x inv_bufs buffers.
        return 4 * (2 * C * tH * W + 2 * C * tH
                    + inv_bufs * (tH * W * tH + 2 * C * C + 2 * C))

    def vmem_limit(need):
        if need <= (12 << 20):            # comfortably inside the default scoped limit
            return None
        # Never request less than the computed need (shrinking tH is the tile
        # picker's job); prefer to leave >= 45% of physical VMEM for the compiler.
        return max(min(need + (4 << 20), int(0.55 * vmem_cap)), need)

    args = (px_flat, avg, w1, b1_col, w2, b2_col)
    try:
        out = _build_call(B, C, H, W, tH, True, vmem_limit(vmem_need(1)))(*args)
        return jax.block_until_ready(out)
    except Exception:
        # pl.Buffered(1) not accepted by this JAX/Mosaic build -> default buffering.
        return _build_call(B, C, H, W, tH, False, vmem_limit(vmem_need(2)))(*args)


def latitude_adaptive_ref(px, w1, b1, w2, b2):
    """Pure-JAX reference mirroring the PyTorch forward exactly."""
    B, C, H, W = px.shape
    hx = jnp.maximum(-jnp.log(px) / math.log(2.0), 0.0)
    hx_mean = hx.mean(axis=3)                               # (B, C, H)
    hx_mean_2d = jnp.transpose(hx_mean, (0, 2, 1)).reshape(-1, C)
    x = hx_mean_2d @ w1.T + b1
    x = jnp.maximum(x, 0.0)
    x = x @ w2.T + b2
    x = jax.nn.sigmoid(x)
    yita = jnp.transpose(x.reshape(B, H, C), (0, 2, 1))     # (B, C, H)
    return yita


if __name__ == "__main__":
    B, C, H, W = 2, 4, 16, 16

    key = jax.random.PRNGKey(0)
    k_px, k_w1, k_b1, k_w2, k_b2 = jax.random.split(key, 5)

    # px must be positive (probabilities); keep away from 0 for log.
    px = jax.random.uniform(k_px, (B, C, H, W), dtype=jnp.float32,
                            minval=1e-3, maxval=1.0)

    # nn.Linear(C, C) shapes: weight (C, C), bias (C,).
    bound = 1.0 / math.sqrt(C)
    w1 = jax.random.uniform(k_w1, (C, C), jnp.float32, -bound, bound)
    b1 = jax.random.uniform(k_b1, (C,), jnp.float32, -bound, bound)
    w2 = jax.random.uniform(k_w2, (C, C), jnp.float32, -bound, bound)
    b2 = jax.random.uniform(k_b2, (C,), jnp.float32, -bound, bound)

    out = latitude_adaptive(px, w1, b1, w2, b2)
    out = jax.block_until_ready(out)

    ref = latitude_adaptive_ref(px, w1, b1, w2, b2)
    assert out.shape == (B, C, H), out.shape
    assert jnp.allclose(out, ref, atol=1e-5, rtol=1e-5), "mismatch vs reference"

    print("KERNEL_OK")
</pallas_src>

<mosaic_0001>
module attributes {stable_mosaic.version = 11 : i64} {
  func.func @_kernel(%arg0: i32, %arg1: i32, %arg2: memref<1x4x256xf32, #tpu.memory_space<vmem>>, %arg3: memref<256x16xf32, #tpu.memory_space<vmem>>, %arg4: memref<4x4xf32, #tpu.memory_space<vmem>>, %arg5: memref<4x1xf32, #tpu.memory_space<vmem>>, %arg6: memref<4x4xf32, #tpu.memory_space<vmem>>, %arg7: memref<4x1xf32, #tpu.memory_space<vmem>>, %arg8: memref<1x4x16xf32, #tpu.memory_space<vmem>>) attributes {dimension_semantics = [#tpu.dimension_semantics<parallel>, #tpu.dimension_semantics<parallel>], iteration_bounds = array<i64: 2, 1>, scalar_prefetch = 0 : i64, scratch_operands = 0 : i64, tpu.core_type = #tpu.core_type<tc>, window_params = [{transform_indices = @transform_0, window_bounds = array<i64: 1, 4, 256>}, {pipeline_mode = #tpu.pipeline_mode<synchronous>, transform_indices = @transform_1, window_bounds = array<i64: 256, 16>}, {pipeline_mode = #tpu.pipeline_mode<synchronous>, transform_indices = @transform_2, window_bounds = array<i64: 4, 4>}, {pipeline_mode = #tpu.pipeline_mode<synchronous>, transform_indices = @transform_3, window_bounds = array<i64: 4, 1>}, {pipeline_mode = #tpu.pipeline_mode<synchronous>, transform_indices = @transform_4, window_bounds = array<i64: 4, 4>}, {pipeline_mode = #tpu.pipeline_mode<synchronous>, transform_indices = @transform_5, window_bounds = array<i64: 4, 1>}, {transform_indices = @transform_6, window_bounds = array<i64: 1, 4, 16>}]} {
    %c0 = arith.constant 0 : index
    %c0_0 = arith.constant 0 : index
    %c0_1 = arith.constant 0 : index
    %0 = vector.load %arg2[%c0, %c0_0, %c0_1] : memref<1x4x256xf32, #tpu.memory_space<vmem>>, vector<1x4x256xf32>
    %1 = vector.shape_cast %0 : vector<1x4x256xf32> to vector<4x256xf32>
    %2 = math.log %1 : vector<4x256xf32>
    %cst = arith.constant -1.44269502 : f32
    %3 = vector.broadcast %cst : f32 to vector<4x256xf32>
    %4 = arith.mulf %2, %3 : vector<4x256xf32>
    %cst_2 = arith.constant 0.000000e+00 : f32
    %5 = vector.broadcast %cst_2 : f32 to vector<4x256xf32>
    %6 = arith.maximumf %4, %5 : vector<4x256xf32>
    %c0_3 = arith.constant 0 : index
    %c0_4 = arith.constant 0 : index
    %7 = vector.load %arg3[%c0_3, %c0_4] : memref<256x16xf32, #tpu.memory_space<vmem>>, vector<256x16xf32>
    %cst_5 = arith.constant dense<0.000000e+00> : vector<4x16xf32>
    %8 = tpu.matmul %6, %7, %cst_5 {dimension_numbers = #tpu.dot_dimension_numbers<[1], [0], [0], [1], [0, 0, 1, 1], [], []>} : vector<4x256xf32>, vector<256x16xf32>, vector<4x16xf32> -> vector<4x16xf32>
    %c0_6 = arith.constant 0 : index
    %c0_7 = arith.constant 0 : index
    %9 = vector.load %arg4[%c0_6, %c0_7] : memref<4x4xf32, #tpu.memory_space<vmem>>, vector<4x4xf32>
    %cst_8 = arith.constant dense<0.000000e+00> : vector<4x16xf32>
    %10 = tpu.matmul %9, %8, %cst_8 {dimension_numbers = #tpu.dot_dimension_numbers<[1], [0], [0], [1], [0, 0, 1, 1], [], []>} : vector<4x4xf32>, vector<4x16xf32>, vector<4x16xf32> -> vector<4x16xf32>
    %c0_9 = arith.constant 0 : index
    %c0_10 = arith.constant 0 : index
    %11 = vector.load %arg5[%c0_9, %c0_10] : memref<4x1xf32, #tpu.memory_space<vmem>>, vector<4x1xf32>
    %12 = vector.broadcast %11 : vector<4x1xf32> to vector<4x16xf32>
    %13 = arith.addf %10, %12 : vector<4x16xf32>
    %cst_11 = arith.constant 0.000000e+00 : f32
    %14 = vector.broadcast %cst_11 : f32 to vector<4x16xf32>
    %15 = arith.maximumf %13, %14 : vector<4x16xf32>
    %c0_12 = arith.constant 0 : index
    %c0_13 = arith.constant 0 : index
    %16 = vector.load %arg6[%c0_12, %c0_13] : memref<4x4xf32, #tpu.memory_space<vmem>>, vector<4x4xf32>
    %cst_14 = arith.constant dense<0.000000e+00> : vector<4x16xf32>
    %17 = tpu.matmul %16, %15, %cst_14 {dimension_numbers = #tpu.dot_dimension_numbers<[1], [0], [0], [1], [0, 0, 1, 1], [], []>} : vector<4x4xf32>, vector<4x16xf32>, vector<4x16xf32> -> vector<4x16xf32>
    %c0_15 = arith.constant 0 : index
    %c0_16 = arith.constant 0 : index
    %18 = vector.load %arg7[%c0_15, %c0_16] : memref<4x1xf32, #tpu.memory_space<vmem>>, vector<4x1xf32>
    %19 = vector.broadcast %18 : vector<4x1xf32> to vector<4x16xf32>
    %20 = arith.addf %17, %19 : vector<4x16xf32>
    %21 = arith.negf %20 : vector<4x16xf32>
    %22 = math.exp %21 : vector<4x16xf32>
    %cst_17 = arith.constant 1.000000e+00 : f32
    %23 = vector.broadcast %cst_17 : f32 to vector<4x16xf32>
    %24 = arith.addf %23, %22 : vector<4x16xf32>
    %25 = arith.divf %23, %24 : vector<4x16xf32>
    %c0_18 = arith.constant 0 : index
    %c0_19 = arith.constant 0 : index
    %c0_20 = arith.constant 0 : index
    %26 = vector.load %arg8[%c0_18, %c0_19, %c0_20] : memref<1x4x16xf32, #tpu.memory_space<vmem>>, vector<1x4x16xf32>
    %27 = vector.shape_cast %26 : vector<1x4x16xf32> to vector<4x16xf32>
    %28 = vector.shape_cast %25 : vector<4x16xf32> to vector<1x4x16xf32>
    tpu.vector_store %arg8[%c0_18, %c0_19, %c0_20], %28 {strides = array<i32>} : memref<1x4x16xf32, #tpu.memory_space<vmem>>, vector<1x4x16xf32>,
    return
  }
  func.func @transform_0(%arg0: i32, %arg1: i32) -> (i32, i32, i32) {
    %c0_i32 = arith.constant 0 : i32
    %c0_i32_0 = arith.constant 0 : i32
    return %arg0, %c0_i32, %arg1 : i32, i32, i32
  }
  func.func @transform_1(%arg0: i32, %arg1: i32) -> (i32, i32) {
    %c0_i32 = arith.constant 0 : i32
    %c0_i32_0 = arith.constant 0 : i32
    %c0_i32_1 = arith.constant 0 : i32
    return %c0_i32, %c0_i32_0 : i32, i32
  }
  func.func @transform_2(%arg0: i32, %arg1: i32) -> (i32, i32) {
    %c0_i32 = arith.constant 0 : i32
    %c0_i32_0 = arith.constant 0 : i32
    %c0_i32_1 = arith.constant 0 : i32
    return %c0_i32, %c0_i32_0 : i32, i32
  }
  func.func @transform_3(%arg0: i32, %arg1: i32) -> (i32, i32) {
    %c0_i32 = arith.constant 0 : i32
    %c0_i32_0 = arith.constant 0 : i32
    %c0_i32_1 = arith.constant 0 : i32
    return %c0_i32, %c0_i32_0 : i32, i32
  }
  func.func @transform_4(%arg0: i32, %arg1: i32) -> (i32, i32) {
    %c0_i32 = arith.constant 0 : i32
    %c0_i32_0 = arith.constant 0 : i32
    %c0_i32_1 = arith.constant 0 : i32
    return %c0_i32, %c0_i32_0 : i32, i32
  }
  func.func @transform_5(%arg0: i32, %arg1: i32) -> (i32, i32) {
    %c0_i32 = arith.constant 0 : i32
    %c0_i32_0 = arith.constant 0 : i32
    %c0_i32_1 = arith.constant 0 : i32
    return %c0_i32, %c0_i32_0 : i32, i32
  }
  func.func @transform_6(%arg0: i32, %arg1: i32) -> (i32, i32, i32) {
    %c0_i32 = arith.constant 0 : i32
    %c0_i32_0 = arith.constant 0 : i32
    return %arg0, %c0_i32, %arg1 : i32, i32, i32
  }
}

module attributes {stable_mosaic.version = 11 : i64} {
  func.func @_kernel(%arg0: i32, %arg1: i32, %arg2: memref<1x4x256xf32, #tpu.memory_space<vmem>>, %arg3: memref<256x16xf32, #tpu.memory_space<vmem>>, %arg4: memref<4x4xf32, #tpu.memory_space<vmem>>, %arg5: memref<4x1xf32, #tpu.memory_space<vmem>>, %arg6: memref<4x4xf32, #tpu.memory_space<vmem>>, %arg7: memref<4x1xf32, #tpu.memory_space<vmem>>, %arg8: memref<1x4x16xf32, #tpu.memory_space<vmem>>) attributes {dimension_semantics = [#tpu.dimension_semantics<parallel>, #tpu.dimension_semantics<parallel>], iteration_bounds = array<i64: 2, 1>, scalar_prefetch = 0 : i64, scratch_operands = 0 : i64, tpu.core_type = #tpu.core_type<tc>, window_params = [{transform_indices = @transform_0, window_bounds = array<i64: 1, 4, 256>}, {pipeline_mode = #tpu.pipeline_mode<synchronous>, transform_indices = @transform_1, window_bounds = array<i64: 256, 16>}, {pipeline_mode = #tpu.pipeline_mode<synchronous>, transform_indices = @transform_2, window_bounds = array<i64: 4, 4>}, {pipeline_mode = #tpu.pipeline_mode<synchronous>, transform_indices = @transform_3, window_bounds = array<i64: 4, 1>}, {pipeline_mode = #tpu.pipeline_mode<synchronous>, transform_indices = @transform_4, window_bounds = array<i64: 4, 4>}, {pipeline_mode = #tpu.pipeline_mode<synchronous>, transform_indices = @transform_5, window_bounds = array<i64: 4, 1>}, {transform_indices = @transform_6, window_bounds = array<i64: 1, 4, 16>}]} {
    %c0 = arith.constant 0 : index
    %c0_0 = arith.constant 0 : index
    %c0_1 = arith.constant 0 : index
    %0 = vector.load %arg2[%c0, %c0_0, %c0_1] : memref<1x4x256xf32, #tpu.memory_space<vmem>>, vector<1x4x256xf32>
    %1 = vector.shape_cast %0 : vector<1x4x256xf32> to vector<4x256xf32>
    %2 = math.log %1 : vector<4x256xf32>
    %cst = arith.constant -1.44269502 : f32
    %3 = vector.broadcast %cst : f32 to vector<4x256xf32>
    %4 = arith.mulf %2, %3 : vector<4x256xf32>
    %cst_2 = arith.constant 0.000000e+00 : f32
    %5 = vector.broadcast %cst_2 : f32 to vector<4x256xf32>
    %6 = arith.maximumf %4, %5 : vector<4x256xf32>
    %c0_3 = arith.constant 0 : index
    %c0_4 = arith.constant 0 : index
    %7 = vector.load %arg3[%c0_3, %c0_4] : memref<256x16xf32, #tpu.memory_space<vmem>>, vector<256x16xf32>
    %cst_5 = arith.constant dense<0.000000e+00> : vector<4x16xf32>
    %8 = tpu.matmul %6, %7, %cst_5 {dimension_numbers = #tpu.dot_dimension_numbers<[1], [0], [0], [1], [0, 0, 1, 1], [], []>} : vector<4x256xf32>, vector<256x16xf32>, vector<4x16xf32> -> vector<4x16xf32>
    %c0_6 = arith.constant 0 : index
    %c0_7 = arith.constant 0 : index
    %9 = vector.load %arg4[%c0_6, %c0_7] : memref<4x4xf32, #tpu.memory_space<vmem>>, vector<4x4xf32>
    %cst_8 = arith.constant dense<0.000000e+00> : vector<4x16xf32>
    %10 = tpu.matmul %9, %8, %cst_8 {dimension_numbers = #tpu.dot_dimension_numbers<[1], [0], [0], [1], [0, 0, 1, 1], [], []>} : vector<4x4xf32>, vector<4x16xf32>, vector<4x16xf32> -> vector<4x16xf32>
    %c0_9 = arith.constant 0 : index
    %c0_10 = arith.constant 0 : index
    %11 = vector.load %arg5[%c0_9, %c0_10] : memref<4x1xf32, #tpu.memory_space<vmem>>, vector<4x1xf32>
    %12 = vector.broadcast %11 : vector<4x1xf32> to vector<4x16xf32>
    %13 = arith.addf %10, %12 : vector<4x16xf32>
    %cst_11 = arith.constant 0.000000e+00 : f32
    %14 = vector.broadcast %cst_11 : f32 to vector<4x16xf32>
    %15 = arith.maximumf %13, %14 : vector<4x16xf32>
    %c0_12 = arith.constant 0 : index
    %c0_13 = arith.constant 0 : index
    %16 = vector.load %arg6[%c0_12, %c0_13] : memref<4x4xf32, #tpu.memory_space<vmem>>, vector<4x4xf32>
    %cst_14 = arith.constant dense<0.000000e+00> : vector<4x16xf32>
    %17 = tpu.matmul %16, %15, %cst_14 {dimension_numbers = #tpu.dot_dimension_numbers<[1], [0], [0], [1], [0, 0, 1, 1], [], []>} : vector<4x4xf32>, vector<4x16xf32>, vector<4x16xf32> -> vector<4x16xf32>
    %c0_15 = arith.constant 0 : index
    %c0_16 = arith.constant 0 : index
    %18 = vector.load %arg7[%c0_15, %c0_16] : memref<4x1xf32, #tpu.memory_space<vmem>>, vector<4x1xf32>
    %19 = vector.broadcast %18 : vector<4x1xf32> to vector<4x16xf32>
    %20 = arith.addf %17, %19 : vector<4x16xf32>
    %21 = arith.negf %20 : vector<4x16xf32>
    %22 = math.exp %21 : vector<4x16xf32>
    %cst_17 = arith.constant 1.000000e+00 : f32
    %23 = vector.broadcast %cst_17 : f32 to vector<4x16xf32>
    %24 = arith.addf %23, %22 : vector<4x16xf32>
    %25 = arith.divf %23, %24 : vector<4x16xf32>
    %c0_18 = arith.constant 0 : index
    %c0_19 = arith.constant 0 : index
    %c0_20 = arith.constant 0 : index
    %26 = vector.load %arg8[%c0_18, %c0_19, %c0_20] : memref<1x4x16xf32, #tpu.memory_space<vmem>>, vector<1x4x16xf32>
    %27 = vector.shape_cast %26 : vector<1x4x16xf32> to vector<4x16xf32>
    %28 = vector.shape_cast %25 : vector<4x16xf32> to vector<1x4x16xf32>
    tpu.vector_store %arg8[%c0_18, %c0_19, %c0_20], %28 {strides = array<i32>} : memref<1x4x16xf32, #tpu.memory_space<vmem>>, vector<1x4x16xf32>,
    return
  }
  func.func @transform_0(%arg0: i32, %arg1: i32) -> (i32, i32, i32) {
    %c0_i32 = arith.constant 0 : i32
    %c0_i32_0 = arith.constant 0 : i32
    return %arg0, %c0_i32, %arg1 : i32, i32, i32
  }
  func.func @transform_1(%arg0: i32, %arg1: i32) -> (i32, i32) {
    %c0_i32 = arith.constant 0 : i32
    %c0_i32_0 = arith.constant 0 : i32
    %c0_i32_1 = arith.constant 0 : i32
    return %c0_i32, %c0_i32_0 : i32, i32
  }
  func.func @transform_2(%arg0: i32, %arg1: i32) -> (i32, i32) {
    %c0_i32 = arith.constant 0 : i32
    %c0_i32_0 = arith.constant 0 : i32
    %c0_i32_1 = arith.constant 0 : i32
    return %c0_i32, %c0_i32_0 : i32, i32
  }
  func.func @transform_3(%arg0: i32, %arg1: i32) -> (i32, i32) {
    %c0_i32 = arith.constant 0 : i32
    %c0_i32_0 = arith.constant 0 : i32
    %c0_i32_1 = arith.constant 0 : i32
    return %c0_i32, %c0_i32_0 : i32, i32
  }
  func.func @transform_4(%arg0: i32, %arg1: i32) -> (i32, i32) {
    %c0_i32 = arith.constant 0 : i32
    %c0_i32_0 = arith.constant 0 : i32
    %c0_i32_1 = arith.constant 0 : i32
    return %c0_i32, %c0_i32_0 : i32, i32
  }
  func.func @transform_5(%arg0: i32, %arg1: i32) -> (i32, i32) {
    %c0_i32 = arith.constant 0 : i32
    %c0_i32_0 = arith.constant 0 : i32
    %c0_i32_1 = arith.constant 0 : i32
    return %c0_i32, %c0_i32_0 : i32, i32
  }
  func.func @transform_6(%arg0: i32, %arg1: i32) -> (i32, i32, i32) {
    %c0_i32 = arith.constant 0 : i32
    %c0_i32_0 = arith.constant 0 : i32
    return %arg0, %c0_i32, %arg1 : i32, i32, i32
  }
}

</mosaic_0001>

<bundles_post_ra>
// kernel: tpu_custom_call.1
= control target key start
LH: loop header
LB: loop body
LE: loop exit
PB: predicated region body
PF: predicated region fallthrough
CT: control target
= control target key end

     0   :  { %11 = vsyncpa [#allocation3], 0  ;;  %s946_s0 = inlined_call_operand.vmem [shape: f32[2,4,256], index: 0, kind: input, shape index: {}]   ;;  %s947_s1 = inlined_call_operand.vmem [shape: f32[256,16], index: 1, kind: input, shape index: {}]   ;;  %s948_s2 = inlined_call_operand.vmem [shape: f32[4,4], index: 2, kind: input, shape index: {}]   ;;  %s949_s3 = inlined_call_operand.vmem [shape: f32[4,1], index: 3, kind: input, shape index: {}]   ;;  %s950_s4 = inlined_call_operand.vmem [shape: f32[4,4], index: 4, kind: input, shape index: {}]   ;;  %s951_s5 = inlined_call_operand.vmem [shape: f32[4,1], index: 5, kind: input, shape index: {}]   ;;  %s952_s6 = inlined_call_operand.hbm [shape: f32[2,4,16], index: 6, kind: output, shape index: {}]  }
   0x1   :  { %13 = vsyncpa [#allocation3 + $0x1], 0  ;;  %s741_s21 = smov 0   ;;  %s743_s22 = smov 0  }
   0x2   :  { %s745_s23 = smov 0   ;;  %s747_s24 = smov 0  }
   0x3   :  { %s749_s25 = smov 0   ;;  %s751_s26 = smov 0  }
   0x4 LB: > { %s544_s27 = sadd.s32 4294967295, %s703_s26   ;;  %s545_s28 = sadd.s32 4294967294, %s703_s26   ;;  %s703_s26 = sphi %s751_s26, %s19_s26   ;;  %s699_s25 = sphi %s749_s25, %s959_s25   ;;  %s695_s24 = sphi %s747_s24, %s958_s24   ;;  %s691_s23 = sphi %s745_s23, %s957_s23   ;;  %s687_s22 = sphi %s743_s22, %s956_s22   ;;  %s683_s21 = sphi %s741_s21, %s955_s21  }
   0x5   : > { %s31_s29 = sadd.s32 1, %s699_s25  ;;  %s173_s30 = sadd.s32 1, %s691_s23 }
   0x6   : > { %p33_p0 = scmp.ge.s32.totalorder %s31_s29, 2  ;;  %p183_p1 = scmp.ne.s32.totalorder %s691_s23, %s687_s22 }
   0x7   : > { %p184_p2 = scmp.eq.s32.totalorder %s544_s27, 1  ;;  %p189_p3 = scmp.ne.s32.totalorder %s687_s22, %s683_s21 }
   0x8   : > { %s961_s29 = smov (%p33_p0, %s31_s29), 0  ;;  %p190_p5 = scmp.eq.s32.totalorder %s545_s28, 1 }
   0x9   : > { %p781_p4 = por %p184_p2, %p183_p1  ;;  %s168_s8 = ssub.s32 %s699_s25, %s961_s29 }
   0xa   : > { %p548_p6 = scmp.ge.s32.totalorder %s703_s26, 1  ;;  %p171_p7 = scmp.eq.s32.totalorder %s168_s8, 0 }
   0xb   : > { %p788_p8 = por %p190_p5, %p189_p3  ;;  %p236_p9 = scmp.lt.s32.totalorder %s703_s26, 3 }
   0xc   : > { %s794_s10 = scalar_select %p171_p7, %s691_s23, %s173_s30  }
   0xd   : > { %p237_p10 = pnand %p548_p6, %p236_p9 }
   0xe   : > { %p271_p11 = scmp.lt.s32.totalorder (!%p237_p10), %s695_s24, 1  ;;  %s267_s18 = sand.u32 (!%p237_p10), 1, %s687_s22  }
   0xf   : > { %240 = sbr.rel (%p237_p10) target bundleno = 484 (0x1e4), region = 44  ;;  %s549_s19 = sshll.u32 (!%p237_p10), %s267_s18, 2 }
  0x10   : > { %s558_s20 = sshll.u32 (!%p237_p10), %s695_s24, 2  ;;  %s645_s17 = scalar_lea.hbm (!%p237_p10), %s952_s6, 8 }
  0x14   : > { %v300_v0 = vld [vmem:[%s947_s1 + $0x78] sm:$0xff]  ;;  %v299_v2 = vld [vmem:[%s947_s1 + $0x70] sm:$0xff]  ;;  %v298_v4 = vld [vmem:[%s947_s1 + $0x68] sm:$0xff]  ;;  %s272_s30 = scalar_select %p271_p11, %s695_s24, 1  ;;  %v705_v40 = vmov 0   ;;  %vm374_vm0 = vcmask 1043456  }
  0x15   : > { %v316_v1 = vld [vmem:[%s947_s1 + $0xf8] sm:$0xff]  ;;  %323 = vmatpush.msra.mxu0 %v300_v0  ;;  %v315_v3 = vld [vmem:[%s947_s1 + $0xf0] sm:$0xff]  ;;  %v314_v5 = vld [vmem:[%s947_s1 + $0xe8] sm:$0xff]  ;;  %618 = vset.pattern.permute.xlu0 %v705_v40  ;;  %vm370_vm1 = vcmask 31744   ;;  %vm451_vm5 = vcmask 125952   ;;  %s454_s24 = scalar_lea.sflag [#allocation3], %s267_s18 }
  0x16   : > { %343 = vmatpush.msra.mxu1 %v316_v1  ;;  %v297_v6 = vld [vmem:[%s947_s1 + $0x60] sm:$0xff]  ;;  %s561_s14 = sshll.u32 %s272_s30, 3  ;;  %v296_v8 = vld [vmem:[%s947_s1 + $0x58] sm:$0xff]  ;;  %v295_v10 = vld [vmem:[%s947_s1 + $0x50] sm:$0xff]  ;;  %s465_s30 = scalar_lea.hbm %s952_s6, %s558_s20 }
  0x17   : > { %324 = vmatpush.msra.mxu0 %v299_v2  ;;  %v313_v7 = vld [vmem:[%s947_s1 + $0xe0] sm:$0xff]  ;;  %v312_v9 = vld [vmem:[%s947_s1 + $0xd8] sm:$0xff]  ;;  %s278_s27 = scalar_lea.vmem %s946_s0, %s561_s14  ;;  %v311_v11 = vld [vmem:[%s947_s1 + $0xd0] sm:$0xff]  ;;  %s469_s12 = sshll.u32 %s465_s30, 4  ;;  %s470_s12 = int_to_ptr.hbm [resolvable:$true] %s469_s12 }
  0x18   : > { %344 = vmatpush.msra.mxu1 %v315_v3  ;;  %v294_v12 = vld [vmem:[%s947_s1 + $0x48] sm:$0xff]  ;;  %v280_v14 = vld [vmem:[%s278_s27] sm:$0xff]  ;;  %v292_v17 = vld [vmem:[%s947_s1 + $0x38] sm:$0xff]  ;;  %s269_s27 = scalar_lea.vmem [#allocation2], %s549_s19  ;;  %s639_s13 = sshra.s32 %s470_s12, 4  ;;  %s640_s13 = int_to_ptr.hbm [resolvable:$true] %s639_s13 }
  0x19   : > { %325 = vmatpush.msra.mxu0 %v298_v4  ;;  %v310_v13 = vld [vmem:[%s947_s1 + $0xc8] sm:$0xff]  ;;  %619 = vlog2.f32 %v280_v14  ;;  %v293_v15 = vld [vmem:[%s947_s1 + $0x40] sm:$0xff]  ;;  %v308_v18 = vld [vmem:[%s947_s1 + $0xb8] sm:$0xff]  ;;  %s467_s11 = sshll.u32 %s269_s27, 4  ;;  %s641_s15 = scalar_lea.hbm %s640_s13, 4  ;;  %s468_s11 = int_to_ptr.vmem [resolvable:$true] %s467_s11 }
  0x1a   : > { %345 = vmatpush.msra.mxu1 %v314_v5  ;;  %v309_v16 = vld [vmem:[%s947_s1 + $0xc0] sm:$0xff]  ;;  %v291_v19 = vld [vmem:[%s947_s1 + $0x30] sm:$0xff]  ;;  %v290_v22 = vld [vmem:[%s947_s1 + $0x28] sm:$0xff]  ;;  %p642_p12 = scmp.ne.s32.totalorder %s640_s13, %s641_s15  ;;  %p646_p1 = scmp.lt.s32.totalorder %s640_s13, %s952_s6 }
  0x1b   : > { %326 = vmatpush.msra.mxu0 %v297_v6  ;;  %v307_v20 = vld [vmem:[%s947_s1 + $0xb0] sm:$0xff]  ;;  %v306_v23 = vld [vmem:[%s947_s1 + $0xa8] sm:$0xff]  ;;  %v289_v25 = vld [vmem:[%s947_s1 + $0x20] sm:$0xff]  ;;  %p647_p2 = scmp.lt.s32.totalorder %s645_s17, %s641_s15 }
  0x1c   : > { %346 = vmatpush.msra.mxu1 %v313_v7  ;;  %v305_v26 = vld [vmem:[%s947_s1 + $0xa0] sm:$0xff]  ;;  %v288_v28 = vld [vmem:[%s947_s1 + $0x18] sm:$0xff]  ;;  %v287_v31 = vld [vmem:[%s947_s1 + $0x10] sm:$0xff]  ;;  %p643_p13 = pnand %p642_p12, %p781_p4 }
  0x1d   : > { %327 = vmatpush.msra.mxu0 %v296_v8  ;;  %v304_v29 = vld [vmem:[%s947_s1 + $0x98] sm:$0xff]  ;;  %v303_v32 = vld [vmem:[%s947_s1 + $0x90] sm:$0xff]  ;;  %v286_v33 = vld [vmem:[%s947_s1 + $0x8] sm:$0xff]  ;;  %p648_p3 = por %p647_p2, %p646_p1 }
  0x1e   : > { %347 = vmatpush.msra.mxu1 %v312_v9  ;;  %v302_v34 = vld [vmem:[%s947_s1 + $0x88] sm:$0xff]  ;;  %v285_v35 = vld [vmem:[%s947_s1] sm:$0xff]  ;;  %p644_p0 = pneg %p643_p13 }
  0x1f   : > { %328 = vmatpush.msra.mxu0 %v295_v10  ;;  %v620_v21 = vpop.eup %619  ;;  %v301_v36 = vld [vmem:[%s947_s1 + $0x80] sm:$0xff] }
  0x20   : > { %348 = vmatpush.msra.mxu1 %v311_v11  ;;  %v282_v24 = vmul.f32 0.6931472, %v620_v21  ;;  %v364_v39 = vld [vmem:[%s949_s3] sm:$0xf]  ;;  %p649_p5 = pnand %p648_p3, %p644_p0 }
  0x21   : > { %329 = vmatpush.msra.mxu0 %v294_v12  ;;  %367 = vperm.xlu0 %618, %v364_v39   ;;  %v400_v41 = vld [vmem:[%s951_s5] sm:$0xf] }
  0x22   : > { %349 = vmatpush.msra.mxu1 %v310_v13  ;;  %v283_v27 = vmul.f32 -1.442695, %v282_v24  ;;  %v363_v45 = vld [vmem:[%s948_s2] sm:$0xf] }
  0x23   : > { %330 = vmatpush.msra.mxu0 %v293_v15  ;;  %v399_v50 = vld [vmem:[%s950_s4] sm:$0xf] }
  0x24   : > { %350 = vmatpush.msra.mxu1 %v309_v16  ;;  %v284_v30 = vmax.f32 %v283_v27, 0.0 }
  0x25   : > { %331 = vmatpush.msra.mxu0 %v292_v17 }
  0x26   : > { %351 = vmatpush.msra.mxu1 %v308_v18  ;;  %318 = vst [vmem:[#allocation1] ss:$2 sm:$0xff] %v284_v30 }
  0x27   : > { %332 = vmatpush.msra.mxu0 %v291_v19 }
  0x28   : > { %352 = vmatpush.msra.mxu1 %v307_v20 }
  0x29   : > { %333 = vmatpush.msra.mxu0 %v290_v22  ;;  %403 = vperm.xlu0 %618, %v400_v41  }
  0x2a   : > { %353 = vmatpush.msra.mxu1 %v306_v23 }
  0x2b   : > { %334 = vmatpush.msra.mxu0 %v289_v25 }
  0x2c   : > { %354 = vmatpush.msra.mxu1 %v305_v26 }
  0x2d   : > { %335 = vmatpush.msra.mxu0 %v288_v28  ;;  %v319_v37 = vld.sshfl [vmem:[#allocation1] sm:$0xff pattern:$0x75316420]  ;;  %v320_v38 = vld.sshfl [vmem:[#allocation1 + $0x8] sm:$0xff pattern:$0x75316420] }
  0x2e   : > { %355 = vmatpush.msra.mxu1 %v304_v29 }
  0x2f   : > { %336 = vmatpush.msra.mxu0 %v287_v31 }
  0x30   : > { %356 = vmatpush.msra.mxu1 %v303_v32 }
  0x31   : > { %337 = vmatpush.msra.mxu0 %v286_v33 }
  0x32   : > { %357 = vmatpush.msra.mxu1 %v302_v34 }
  0x33   : > { %338 = vmatpush.msra.mxu0 %v285_v35 }
  0x34   : > { %358 = vmatpush.msra.mxu1 %v301_v36  ;;  %339 = vmatmul.f32.vlgmr.msra.gmra.mxu0 %v319_v37 }
  0x35   : > { %359 = vmatmul.f32.vlgmr.msra.gmra.mxu1 %v320_v38 }
  0x93   : > { %v368_v46 = vpop.permute.xlu0 %367 }
  0x9b   : > { %v404_v51 = vpop.permute.xlu0 %403 }
  0xb1   : > { %v340_v42 = vpop.f32.mrf.mxu0 }
  0xb2   : > { %v360_v43 = vpop.f32.mrf.mxu1 }
  0xb3   : > { %v361_v44 = vadd.f32 %v360_v43, %v340_v42 }
  0xb5   : > { %552 = vmatpush.msk.msra.mxu2 %vm374_vm0, %v361_v44 }
  0xb6   : > { %553 = vmatmul.msk.f32.vlgmr.msra.gmra.mxu2 %vm370_vm1, %v363_v45 }
 0x139   : > { %v395_v47 = vpop.f32.mrf.mxu2 }
 0x13a   : > { %v396_v48 = vadd.f32 %v395_v47, %v368_v46 }
 0x13c   : > { %v398_v49 = vmax.f32 %v396_v48, 0.0 }
 0x13e   : > { %554 = vmatpush.msk.msra.mxu3 %vm374_vm0, %v398_v49 }
 0x13f   : > { %555 = vmatmul.msk.f32.vlgmr.msra.gmra.mxu3 %vm370_vm1, %v399_v50 }
 0x1c2   : > { %v429_v52 = vpop.f32.mrf.mxu3 }
 0x1c3   : > { %v430_v53 = vadd.f32 %v429_v52, %v404_v51 }
 0x1c5   : > { %v556_v54 = vmul.f32 -1.442695, %v430_v53 }
 0x1c7   : > { %621 = vpow2.f32 %v556_v54 }
 0x1cd   : > { %v622_v55 = vpop.eup %621 }
 0x1ce   : > { %v435_v56 = vadd.f32 1.0, %v622_v55 }
 0x1d0   : > { %623 = vrcp.f32 %v435_v56  ;;  %v447_v60 = vand.u32 2147483648, %v435_v56  ;;  %v445_v62 = vand.u32 2147483647, %v435_v56  ;;  %vm441_vm3 = vweird.f32 %v435_v56 }
 0x1d2   : > { %v448_v0 = vor.u32 1.1754944e-38, %v447_v60  ;;  %vm446_vm6 = vcmp.eq.f32.partialorder %v445_v62, 8.507059e+37 }
 0x1d6   : > { %v624_v57 = vpop.eup %623 }
 0x1d7   : > { %v437_v58 = vmul.f32 %v624_v57, %v435_v56  ;;  %vm442_vm2 = vweird.f32 %v624_v57 }
 0x1d8   : > { %vm443_vm4 = vmor %vm441_vm3, %vm442_vm2 }
 0x1d9   : > { %v438_v59 = vsub.f32 1.0, %v437_v58 }
 0x1db   : > { %v439_v61 = vmul.f32 %v624_v57, %v438_v59 }
 0x1dd   : > { %v440_v63 = vadd.f32 %v624_v57, %v439_v61 }
 0x1df   : > { %v444_v1 = vsel %vm443_vm4, %v624_v57, %v440_v63 }
 0x1e0   : > { %v449_v2 = vsel %vm446_vm6, %v448_v0, %v444_v1 }
 0x1e1   : > { %452 = vst.msk [vmem:[%s269_s27] sm:$0xf] %vm451_vm5, %v449_v2 }
 0x1e2   : > { %652 = shalt.err (!%p649_p5)
}
 0x1e3   : > { %562 = dma.vmem_to_hbm [thread:$0]  (%p781_p4), %s468_s11, 64, %s470_s12, %s454_s24  }
 0x1e4 PF: > { %p568_p6 = scmp.ge.s32.totalorder %s703_s26, 2  ;;  %s481_s18 = sand.u32 1, %s683_s21  }
 0x1e5   : > { %s482_s28 = scalar_lea.sflag [#allocation3], %s481_s18 }
 0x1e6   : > { %p565_p7 = pnand %p568_p6, %p788_p8 }
 0x1e8   : > { %p566_p9 = pneg %p565_p7 }
 0x1ea   : > { %678 = dma.done.wait (%p566_p9), %s482_s28, 64  }
 0x1eb   : > { %680 = vsyncadd (%p566_p9), %s482_s28, 4294967232  ;;  %s19_s26 = sadd.s32 1, %s703_s26   ;;  %s955_s21 = smov %s687_s22 }
 0x1ec   : > { %p16_p10 = scmp.ge.s32.totalorder %s19_s26, 4   ;;  %s956_s22 = smov %s691_s23 }
 0x1ed   : > { %s957_s23 = smov %s794_s10  ;;  %s958_s24 = smov %s699_s25 }
 0x1ee   : > { %s959_s25 = smov %s961_s29  ;;  %18 = sbr.rel (!%p16_p10) target bundleno = 4 (0x4), region = 79 }
 0x1f3   :  { %488 = vsyncpa [#allocation3], 1 }
 0x1f4   :  { %490 = vsyncpa [#allocation3 + $0x1], 1 }

// kernel: tpu_custom_call.1
= control target key start
LH: loop header
LB: loop body
LE: loop exit
PB: predicated region body
PF: predicated region fallthrough
CT: control target
= control target key end

     0   :  { %11 = vsyncpa [#allocation3], 0  ;;  %s946_s0 = inlined_call_operand.vmem [shape: f32[2,4,256], index: 0, kind: input, shape index: {}]   ;;  %s947_s1 = inlined_call_operand.vmem [shape: f32[256,16], index: 1, kind: input, shape index: {}]   ;;  %s948_s2 = inlined_call_operand.vmem [shape: f32[4,4], index: 2, kind: input, shape index: {}]   ;;  %s949_s3 = inlined_call_operand.vmem [shape: f32[4,1], index: 3, kind: input, shape index: {}]   ;;  %s950_s4 = inlined_call_operand.vmem [shape: f32[4,4], index: 4, kind: input, shape index: {}]   ;;  %s951_s5 = inlined_call_operand.vmem [shape: f32[4,1], index: 5, kind: input, shape index: {}]   ;;  %s952_s6 = inlined_call_operand.hbm [shape: f32[2,4,16], index: 6, kind: output, shape index: {}]  }
   0x1   :  { %13 = vsyncpa [#allocation3 + $0x1], 0  ;;  %s741_s21 = smov 0   ;;  %s743_s22 = smov 0  }
   0x2   :  { %s745_s23 = smov 0   ;;  %s747_s24 = smov 0  }
   0x3   :  { %s749_s25 = smov 0   ;;  %s751_s26 = smov 0  }
   0x4 LB: > { %s544_s27 = sadd.s32 4294967295, %s703_s26   ;;  %s545_s28 = sadd.s32 4294967294, %s703_s26   ;;  %s703_s26 = sphi %s751_s26, %s19_s26   ;;  %s699_s25 = sphi %s749_s25, %s959_s25   ;;  %s695_s24 = sphi %s747_s24, %s958_s24   ;;  %s691_s23 = sphi %s745_s23, %s957_s23   ;;  %s687_s22 = sphi %s743_s22, %s956_s22   ;;  %s683_s21 = sphi %s741_s21, %s955_s21  }
   0x5   : > { %s31_s29 = sadd.s32 1, %s699_s25  ;;  %s173_s30 = sadd.s32 1, %s691_s23 }
   0x6   : > { %p33_p0 = scmp.ge.s32.totalorder %s31_s29, 2  ;;  %p183_p1 = scmp.ne.s32.totalorder %s691_s23, %s687_s22 }
   0x7   : > { %p184_p2 = scmp.eq.s32.totalorder %s544_s27, 1  ;;  %p189_p3 = scmp.ne.s32.totalorder %s687_s22, %s683_s21 }
   0x8   : > { %s961_s29 = smov (%p33_p0, %s31_s29), 0  ;;  %p190_p5 = scmp.eq.s32.totalorder %s545_s28, 1 }
   0x9   : > { %p781_p4 = por %p184_p2, %p183_p1  ;;  %s168_s8 = ssub.s32 %s699_s25, %s961_s29 }
   0xa   : > { %p548_p6 = scmp.ge.s32.totalorder %s703_s26, 1  ;;  %p171_p7 = scmp.eq.s32.totalorder %s168_s8, 0 }
   0xb   : > { %p788_p8 = por %p190_p5, %p189_p3  ;;  %p236_p9 = scmp.lt.s32.totalorder %s703_s26, 3 }
   0xc   : > { %s794_s10 = scalar_select %p171_p7, %s691_s23, %s173_s30  }
   0xd   : > { %p237_p10 = pnand %p548_p6, %p236_p9 }
   0xe   : > { %p271_p11 = scmp.lt.s32.totalorder (!%p237_p10), %s695_s24, 1  ;;  %s267_s18 = sand.u32 (!%p237_p10), 1, %s687_s22  }
   0xf   : > { %240 = sbr.rel (%p237_p10) target bundleno = 484 (0x1e4), region = 44  ;;  %s549_s19 = sshll.u32 (!%p237_p10), %s267_s18, 2 }
  0x10   : > { %s558_s20 = sshll.u32 (!%p237_p10), %s695_s24, 2  ;;  %s645_s17 = scalar_lea.hbm (!%p237_p10), %s952_s6, 8 }
  0x14   : > { %v300_v0 = vld [vmem:[%s947_s1 + $0x78] sm:$0xff]  ;;  %v299_v2 = vld [vmem:[%s947_s1 + $0x70] sm:$0xff]  ;;  %v298_v4 = vld [vmem:[%s947_s1 + $0x68] sm:$0xff]  ;;  %s272_s30 = scalar_select %p271_p11, %s695_s24, 1  ;;  %v705_v40 = vmov 0   ;;  %vm374_vm0 = vcmask 1043456  }
  0x15   : > { %v316_v1 = vld [vmem:[%s947_s1 + $0xf8] sm:$0xff]  ;;  %323 = vmatpush.msra.mxu0 %v300_v0  ;;  %v315_v3 = vld [vmem:[%s947_s1 + $0xf0] sm:$0xff]  ;;  %v314_v5 = vld [vmem:[%s947_s1 + $0xe8] sm:$0xff]  ;;  %618 = vset.pattern.permute.xlu0 %v705_v40  ;;  %vm370_vm1 = vcmask 31744   ;;  %vm451_vm5 = vcmask 125952   ;;  %s454_s24 = scalar_lea.sflag [#allocation3], %s267_s18 }
  0x16   : > { %343 = vmatpush.msra.mxu1 %v316_v1  ;;  %v297_v6 = vld [vmem:[%s947_s1 + $0x60] sm:$0xff]  ;;  %s561_s14 = sshll.u32 %s272_s30, 3  ;;  %v296_v8 = vld [vmem:[%s947_s1 + $0x58] sm:$0xff]  ;;  %v295_v10 = vld [vmem:[%s947_s1 + $0x50] sm:$0xff]  ;;  %s465_s30 = scalar_lea.hbm %s952_s6, %s558_s20 }
  0x17   : > { %324 = vmatpush.msra.mxu0 %v299_v2  ;;  %v313_v7 = vld [vmem:[%s947_s1 + $0xe0] sm:$0xff]  ;;  %v312_v9 = vld [vmem:[%s947_s1 + $0xd8] sm:$0xff]  ;;  %s278_s27 = scalar_lea.vmem %s946_s0, %s561_s14  ;;  %v311_v11 = vld [vmem:[%s947_s1 + $0xd0] sm:$0xff]  ;;  %s469_s12 = sshll.u32 %s465_s30, 4  ;;  %s470_s12 = int_to_ptr.hbm [resolvable:$true] %s469_s12 }
  0x18   : > { %344 = vmatpush.msra.mxu1 %v315_v3  ;;  %v294_v12 = vld [vmem:[%s947_s1 + $0x48] sm:$0xff]  ;;  %v280_v14 = vld [vmem:[%s278_s27] sm:$0xff]  ;;  %v292_v17 = vld [vmem:[%s947_s1 + $0x38] sm:$0xff]  ;;  %s269_s27 = scalar_lea.vmem [#allocation2], %s549_s19  ;;  %s639_s13 = sshra.s32 %s470_s12, 4  ;;  %s640_s13 = int_to_ptr.hbm [resolvable:$true] %s639_s13 }
  0x19   : > { %325 = vmatpush.msra.mxu0 %v298_v4  ;;  %v310_v13 = vld [vmem:[%s947_s1 + $0xc8] sm:$0xff]  ;;  %619 = vlog2.f32 %v280_v14  ;;  %v293_v15 = vld [vmem:[%s947_s1 + $0x40] sm:$0xff]  ;;  %v308_v18 = vld [vmem:[%s947_s1 + $0xb8] sm:$0xff]  ;;  %s467_s11 = sshll.u32 %s269_s27, 4  ;;  %s641_s15 = scalar_lea.hbm %s640_s13, 4  ;;  %s468_s11 = int_to_ptr.vmem [resolvable:$true] %s467_s11 }
  0x1a   : > { %345 = vmatpush.msra.mxu1 %v314_v5  ;;  %v309_v16 = vld [vmem:[%s947_s1 + $0xc0] sm:$0xff]  ;;  %v291_v19 = vld [vmem:[%s947_s1 + $0x30] sm:$0xff]  ;;  %v290_v22 = vld [vmem:[%s947_s1 + $0x28] sm:$0xff]  ;;  %p642_p12 = scmp.ne.s32.totalorder %s640_s13, %s641_s15  ;;  %p646_p1 = scmp.lt.s32.totalorder %s640_s13, %s952_s6 }
  0x1b   : > { %326 = vmatpush.msra.mxu0 %v297_v6  ;;  %v307_v20 = vld [vmem:[%s947_s1 + $0xb0] sm:$0xff]  ;;  %v306_v23 = vld [vmem:[%s947_s1 + $0xa8] sm:$0xff]  ;;  %v289_v25 = vld [vmem:[%s947_s1 + $0x20] sm:$0xff]  ;;  %p647_p2 = scmp.lt.s32.totalorder %s645_s17, %s641_s15 }
  0x1c   : > { %346 = vmatpush.msra.mxu1 %v313_v7  ;;  %v305_v26 = vld [vmem:[%s947_s1 + $0xa0] sm:$0xff]  ;;  %v288_v28 = vld [vmem:[%s947_s1 + $0x18] sm:$0xff]  ;;  %v287_v31 = vld [vmem:[%s947_s1 + $0x10] sm:$0xff]  ;;  %p643_p13 = pnand %p642_p12, %p781_p4 }
  0x1d   : > { %327 = vmatpush.msra.mxu0 %v296_v8  ;;  %v304_v29 = vld [vmem:[%s947_s1 + $0x98] sm:$0xff]  ;;  %v303_v32 = vld [vmem:[%s947_s1 + $0x90] sm:$0xff]  ;;  %v286_v33 = vld [vmem:[%s947_s1 + $0x8] sm:$0xff]  ;;  %p648_p3 = por %p647_p2, %p646_p1 }
  0x1e   : > { %347 = vmatpush.msra.mxu1 %v312_v9  ;;  %v302_v34 = vld [vmem:[%s947_s1 + $0x88] sm:$0xff]  ;;  %v285_v35 = vld [vmem:[%s947_s1] sm:$0xff]  ;;  %p644_p0 = pneg %p643_p13 }
  0x1f   : > { %328 = vmatpush.msra.mxu0 %v295_v10  ;;  %v620_v21 = vpop.eup %619  ;;  %v301_v36 = vld [vmem:[%s947_s1 + $0x80] sm:$0xff] }
  0x20   : > { %348 = vmatpush.msra.mxu1 %v311_v11  ;;  %v282_v24 = vmul.f32 0.6931472, %v620_v21  ;;  %v364_v39 = vld [vmem:[%s949_s3] sm:$0xf]  ;;  %p649_p5 = pnand %p648_p3, %p644_p0 }
  0x21   : > { %329 = vmatpush.msra.mxu0 %v294_v12  ;;  %367 = vperm.xlu0 %618, %v364_v39   ;;  %v400_v41 = vld [vmem:[%s951_s5] sm:$0xf] }
  0x22   : > { %349 = vmatpush.msra.mxu1 %v310_v13  ;;  %v283_v27 = vmul.f32 -1.442695, %v282_v24  ;;  %v363_v45 = vld [vmem:[%s948_s2] sm:$0xf] }
  0x23   : > { %330 = vmatpush.msra.mxu0 %v293_v15  ;;  %v399_v50 = vld [vmem:[%s950_s4] sm:$0xf] }
  0x24   : > { %350 = vmatpush.msra.mxu1 %v309_v16  ;;  %v284_v30 = vmax.f32 %v283_v27, 0.0 }
  0x25   : > { %331 = vmatpush.msra.mxu0 %v292_v17 }
  0x26   : > { %351 = vmatpush.msra.mxu1 %v308_v18  ;;  %318 = vst [vmem:[#allocation1] ss:$2 sm:$0xff] %v284_v30 }
  0x27   : > { %332 = vmatpush.msra.mxu0 %v291_v19 }
  0x28   : > { %352 = vmatpush.msra.mxu1 %v307_v20 }
  0x29   : > { %333 = vmatpush.msra.mxu0 %v290_v22  ;;  %403 = vperm.xlu0 %618, %v400_v41  }
  0x2a   : > { %353 = vmatpush.msra.mxu1 %v306_v23 }
  0x2b   : > { %334 = vmatpush.msra.mxu0 %v289_v25 }
  0x2c   : > { %354 = vmatpush.msra.mxu1 %v305_v26 }
  0x2d   : > { %335 = vmatpush.msra.mxu0 %v288_v28  ;;  %v319_v37 = vld.sshfl [vmem:[#allocation1] sm:$0xff pattern:$0x75316420]  ;;  %v320_v38 = vld.sshfl [vmem:[#allocation1 + $0x8] sm:$0xff pattern:$0x75316420] }
  0x2e   : > { %355 = vmatpush.msra.mxu1 %v304_v29 }
  0x2f   : > { %336 = vmatpush.msra.mxu0 %v287_v31 }
  0x30   : > { %356 = vmatpush.msra.mxu1 %v303_v32 }
  0x31   : > { %337 = vmatpush.msra.mxu0 %v286_v33 }
  0x32   : > { %357 = vmatpush.msra.mxu1 %v302_v34 }
  0x33   : > { %338 = vmatpush.msra.mxu0 %v285_v35 }
  0x34   : > { %358 = vmatpush.msra.mxu1 %v301_v36  ;;  %339 = vmatmul.f32.vlgmr.msra.gmra.mxu0 %v319_v37 }
  0x35   : > { %359 = vmatmul.f32.vlgmr.msra.gmra.mxu1 %v320_v38 }
  0x93   : > { %v368_v46 = vpop.permute.xlu0 %367 }
  0x9b   : > { %v404_v51 = vpop.permute.xlu0 %403 }
  0xb1   : > { %v340_v42 = vpop.f32.mrf.mxu0 }
  0xb2   : > { %v360_v43 = vpop.f32.mrf.mxu1 }
  0xb3   : > { %v361_v44 = vadd.f32 %v360_v43, %v340_v42 }
  0xb5   : > { %552 = vmatpush.msk.msra.mxu2 %vm374_vm0, %v361_v44 }
  0xb6   : > { %553 = vmatmul.msk.f32.vlgmr.msra.gmra.mxu2 %vm370_vm1, %v363_v45 }
 0x139   : > { %v395_v47 = vpop.f32.mrf.mxu2 }
 0x13a   : > { %v396_v48 = vadd.f32 %v395_v47, %v368_v46 }
 0x13c   : > { %v398_v49 = vmax.f32 %v396_v48, 0.0 }
 0x13e   : > { %554 = vmatpush.msk.msra.mxu3 %vm374_vm0, %v398_v49 }
 0x13f   : > { %555 = vmatmul.msk.f32.vlgmr.msra.gmra.mxu3 %vm370_vm1, %v399_v50 }
 0x1c2   : > { %v429_v52 = vpop.f32.mrf.mxu3 }
 0x1c3   : > { %v430_v53 = vadd.f32 %v429_v52, %v404_v51 }
 0x1c5   : > { %v556_v54 = vmul.f32 -1.442695, %v430_v53 }
 0x1c7   : > { %621 = vpow2.f32 %v556_v54 }
 0x1cd   : > { %v622_v55 = vpop.eup %621 }
 0x1ce   : > { %v435_v56 = vadd.f32 1.0, %v622_v55 }
 0x1d0   : > { %623 = vrcp.f32 %v435_v56  ;;  %v447_v60 = vand.u32 2147483648, %v435_v56  ;;  %v445_v62 = vand.u32 2147483647, %v435_v56  ;;  %vm441_vm3 = vweird.f32 %v435_v56 }
 0x1d2   : > { %v448_v0 = vor.u32 1.1754944e-38, %v447_v60  ;;  %vm446_vm6 = vcmp.eq.f32.partialorder %v445_v62, 8.507059e+37 }
 0x1d6   : > { %v624_v57 = vpop.eup %623 }
 0x1d7   : > { %v437_v58 = vmul.f32 %v624_v57, %v435_v56  ;;  %vm442_vm2 = vweird.f32 %v624_v57 }
 0x1d8   : > { %vm443_vm4 = vmor %vm441_vm3, %vm442_vm2 }
 0x1d9   : > { %v438_v59 = vsub.f32 1.0, %v437_v58 }
 0x1db   : > { %v439_v61 = vmul.f32 %v624_v57, %v438_v59 }
 0x1dd   : > { %v440_v63 = vadd.f32 %v624_v57, %v439_v61 }
 0x1df   : > { %v444_v1 = vsel %vm443_vm4, %v624_v57, %v440_v63 }
 0x1e0   : > { %v449_v2 = vsel %vm446_vm6, %v448_v0, %v444_v1 }
 0x1e1   : > { %452 = vst.msk [vmem:[%s269_s27] sm:$0xf] %vm451_vm5, %v449_v2 }
 0x1e2   : > { %652 = shalt.err (!%p649_p5)
}
 0x1e3   : > { %562 = dma.vmem_to_hbm [thread:$0]  (%p781_p4), %s468_s11, 64, %s470_s12, %s454_s24  }
 0x1e4 PF: > { %p568_p6 = scmp.ge.s32.totalorder %s703_s26, 2  ;;  %s481_s18 = sand.u32 1, %s683_s21  }
 0x1e5   : > { %s482_s28 = scalar_lea.sflag [#allocation3], %s481_s18 }
 0x1e6   : > { %p565_p7 = pnand %p568_p6, %p788_p8 }
 0x1e8   : > { %p566_p9 = pneg %p565_p7 }
 0x1ea   : > { %678 = dma.done.wait (%p566_p9), %s482_s28, 64  }
 0x1eb   : > { %680 = vsyncadd (%p566_p9), %s482_s28, 4294967232  ;;  %s19_s26 = sadd.s32 1, %s703_s26   ;;  %s955_s21 = smov %s687_s22 }
 0x1ec   : > { %p16_p10 = scmp.ge.s32.totalorder %s19_s26, 4   ;;  %s956_s22 = smov %s691_s23 }
 0x1ed   : > { %s957_s23 = smov %s794_s10  ;;  %s958_s24 = smov %s699_s25 }
 0x1ee   : > { %s959_s25 = smov %s961_s29  ;;  %18 = sbr.rel (!%p16_p10) target bundleno = 4 (0x4), region = 79 }
 0x1f3   :  { %488 = vsyncpa [#allocation3], 1 }
 0x1f4   :  { %490 = vsyncpa [#allocation3 + $0x1], 1 }

</bundles_post_ra>
